<compile_context>
chip_gen: v6e
topology: v6e:2x2x1
jax: 0.10.0
libtpu: 0.0.40
codegen_flags: <defaults>
</compile_context>

<pallas_src>
import warnings

import jax
import jax.numpy as jnp
from jax.experimental import pallas as pl
from jax.experimental.pallas import tpu as pltpu


def _round_up(x, m):
    return ((x + m - 1) // m) * m


def _choose_fold(input_size, hidden_size, output_size, max_fold=8,
                 max_weight_bytes=8 << 20):
    """Rows packed per lane-dense 'super row'.

    fold*output_size targets a multiple of 64/128 lanes so output stores are
    (mostly) unmasked.  max_fold=8 per the perf review: MXU work scales
    linearly with fold (kron zeros are real multiplies), and fold=8 keeps
    K/N as multiples of 128 while halving MXU time vs fold=16.
    """
    if 128 % output_size == 0:
        fold = min(max_fold, 128 // output_size)
    else:
        warnings.warn(
            "output_size does not divide 128: falling back to fold=1 "
            "(results stay correct, but output stores become narrow masked "
            "vst's and the MXU sees tiny K/N).")
        fold = 1
    # Keep the block-diagonal bf16 weights comfortably VMEM-resident.
    while fold > 1 and 2 * fold * fold * (
            input_size * hidden_size + hidden_size * output_size) > max_weight_bytes:
        fold //= 2
    return max(fold, 1)


def prepare_params(w1, b1, w2, b2, fold, compute_dtype=jnp.bfloat16):
    """One-time weight prep (outside the hot loop).

    w1: (in, hid), b1: (hid,)/(1, hid), w2: (hid, out), b2: (out,)/(1, out).
    Returns block-diagonal folded weights in `compute_dtype` (DMA'd to VMEM once
    per kernel call thanks to the constant index_map) and f32 tiled biases.
    With fold=8 this is ~320 KiB total, i.e. ~0.1-0.4 us of HBM traffic per
    call, comparable to what an in-kernel rebuild would cost in VMEM stores.
    """
    w1 = jnp.asarray(w1)
    w2 = jnp.asarray(w2)
    b1 = jnp.asarray(b1).reshape(1, -1)
    b2 = jnp.asarray(b2).reshape(1, -1)
    eye = jnp.eye(fold, dtype=w1.dtype)
    w1f = jnp.kron(eye, w1).astype(compute_dtype)       # (fold*in,  fold*hid)
    w2f = jnp.kron(eye, w2).astype(compute_dtype)       # (fold*hid, fold*out)
    b1f = jnp.tile(b1, (1, fold)).astype(jnp.float32)   # (1, fold*hid)
    b2f = jnp.tile(b2, (1, fold)).astype(jnp.float32)   # (1, fold*out)
    return w1f, b1f, w2f, b2f


def _qnet_kernel(x_ref, w1_ref, b1_ref, w2_ref, b2_ref, o_ref):
    # In-kernel f32 -> bf16 cast of the streamed activations (VPU has ample
    # slack); saves a full wrapper-side HBM pass over x.
    x = x_ref[...].astype(w1_ref.dtype)
    # layer 1: bf16 x bf16 MXU matmul, f32 accumulation
    h = jnp.dot(x, w1_ref[...], preferred_element_type=jnp.float32)
    # bias + ReLU in f32 on the VPU (fine on v5e, which has no bf16 VPU path)
    h = jnp.maximum(h + b1_ref[...], 0.0)
    # layer 2: cast only the MXU input down to the weight dtype
    out = jnp.dot(h.astype(w2_ref.dtype), w2_ref[...],
                  preferred_element_type=jnp.float32)
    o_ref[...] = (out + b2_ref[...]).astype(o_ref.dtype)


def _plan_tiles(batch, fold, max_rows_per_tile=4096):
    """Pick the number of tiles FIRST, then the tile size (review item 3 & 4).

    - >= 2 (even) tiles whenever B > 128, so v7x's two TensorCores each get
      work and DMA of step i+1 overlaps compute of step i.
    - Padding is bounded by n_tiles*8*fold - 1 rows (no padding cliff).
    """
    step = 8 * fold                      # folded sublane dim must be a multiple of 8
    b_min = _round_up(batch, step)
    n_tiles = pl.cdiv(b_min, max_rows_per_tile)
    if batch > 128:
        n_tiles = max(n_tiles, 2)
    if n_tiles > 1 and n_tiles % 2:
        n_tiles += 1                     # even split across 2 TensorCores
    tile_rows = _round_up(pl.cdiv(b_min, n_tiles), step)
    b_pad = n_tiles * tile_rows
    return n_tiles, tile_rows, b_pad


def linear_qnet_forward(x, w1f, b1f, w2f, b2f, *, fold,
                        out_dtype=jnp.float32, max_rows_per_tile=4096):
    """x: (B, input_size) float (any float dtype; cast to bf16 in-kernel).
    Folded params from prepare_params().  Returns (B, output_size) out_dtype."""
    B, in_f = x.shape
    fold_in, fold_hid = w1f.shape
    fold_hid2, fold_out = w2f.shape
    if fold_in != fold * in_f or fold_hid != fold_hid2:
        raise ValueError("folded weights inconsistent with x / fold")
    hid = fold_hid // fold
    out_f = fold_out // fold

    n_tiles, tile_rows, b_pad = _plan_tiles(B, fold, max_rows_per_tile)
    if b_pad != B:
        x = jnp.pad(x, ((0, b_pad - B), (0, 0)))   # bounded, only when needed

    # Pack `fold` rows per super-row: free row-major reshape (no dtype change).
    xf = x.reshape(b_pad // fold, fold_in)
    rows = tile_rows // fold                        # folded rows per grid step

    # VMEM budget: resident weights/biases (x2 for the default double-buffering
    # of constant-index blocks) + double-buffered streamed x / out tiles + slack.
    x_isize = jnp.dtype(xf.dtype).itemsize
    o_isize = jnp.dtype(out_dtype).itemsize
    weight_bytes = (w1f.size * w1f.dtype.itemsize + w2f.size * w2f.dtype.itemsize
                    + b1f.size * b1f.dtype.itemsize + b2f.size * b2f.dtype.itemsize)
    stream_bytes = 2 * rows * (fold_in * x_isize + fold_out * o_isize)
    vmem_limit = int(2 * weight_bytes + stream_bytes + (8 << 20))

    # Actual folded MXU FLOPs (fold x the logical MLP FLOPs) for the scheduler.
    cost = pl.CostEstimate(
        flops=2 * (b_pad // fold) * (fold_in * fold_hid + fold_hid * fold_out),
        transcendentals=0,
        bytes_accessed=int(xf.size * x_isize + weight_bytes
                           + (b_pad // fold) * fold_out * o_isize),
    )

    out_folded = pl.pallas_call(
        _qnet_kernel,
        out_shape=jax.ShapeDtypeStruct((b_pad // fold, fold_out), out_dtype),
        grid=(n_tiles,),
        in_specs=[
            pl.BlockSpec((rows, fold_in), lambda i: (i, 0)),     # streamed x (f32)
            pl.BlockSpec((fold_in, fold_hid), lambda i: (0, 0)),  # resident W1f
            pl.BlockSpec((1, fold_hid), lambda i: (0, 0)),        # resident b1f
            pl.BlockSpec((fold_hid, fold_out), lambda i: (0, 0)),  # resident W2f
            pl.BlockSpec((1, fold_out), lambda i: (0, 0)),         # resident b2f
        ],
        out_specs=pl.BlockSpec((rows, fold_out), lambda i: (i, 0)),
        compiler_params=pltpu.CompilerParams(
            dimension_semantics=("parallel",),      # megacore split on v7x
            vmem_limit_bytes=vmem_limit),
        cost_estimate=cost,
    )(xf, w1f, b1f, w2f, b2f)

    # Undo the fold (free row-major reshape) and strip the batch padding.
    out = out_folded.reshape(b_pad, out_f)
    return out[:B]


def init_params(key, input_size, hidden_size, output_size, dtype=jnp.float32):
    """Deterministic init matching nn.Linear's U(-1/sqrt(fan_in), +1/sqrt(fan_in)).
    Weights stored pre-transposed as (in, out)."""
    k1, k2, k3, k4 = jax.random.split(key, 4)
    bound1 = 1.0 / jnp.sqrt(input_size)
    bound2 = 1.0 / jnp.sqrt(hidden_size)
    w1 = jax.random.uniform(k1, (input_size, hidden_size), dtype, -bound1, bound1)
    b1 = jax.random.uniform(k2, (1, hidden_size), dtype, -bound1, bound1)
    w2 = jax.random.uniform(k3, (hidden_size, output_size), dtype, -bound2, bound2)
    b2 = jax.random.uniform(k4, (1, output_size), dtype, -bound2, bound2)
    return w1, b1, w2, b2


# TODO(synk): Linear_QNet.save() (torch.save of the state dict) is host-side
# checkpointing, not a kernel op; it has no Pallas equivalent.

if __name__ == "__main__":
    # Small shapes consistent with the module's forward: (batch, input_size).
    # batch=200 > 128 exercises the >=2-tile parallel grid and the bounded pad.
    batch, input_size, hidden_size, output_size = 200, 32, 64, 8

    key = jax.random.PRNGKey(0)
    kx, kp = jax.random.split(key)
    x = jax.random.normal(kx, (batch, input_size), jnp.float32)
    w1, b1, w2, b2 = init_params(kp, input_size, hidden_size, output_size)

    fold = _choose_fold(input_size, hidden_size, output_size)   # -> 8 here
    w1f, b1f, w2f, b2f = prepare_params(w1, b1, w2, b2, fold)

    out = linear_qnet_forward(x, w1f, b1f, w2f, b2f, fold=fold)
    out = jax.block_until_ready(out)

    # Pure-JAX reference using the same bf16 rounding points / f32 accumulation.
    f32 = jnp.float32
    xb = x.astype(jnp.bfloat16).astype(f32)
    w1b = w1.astype(jnp.bfloat16).astype(f32)
    w2b = w2.astype(jnp.bfloat16).astype(f32)
    h_ref = jnp.maximum(xb @ w1b + b1, 0.0)
    h_ref = h_ref.astype(jnp.bfloat16).astype(f32)
    ref = h_ref @ w2b + b2

    assert out.shape == (batch, output_size)
    assert jnp.allclose(out, ref, atol=1e-2, rtol=1e-2), \
        float(jnp.max(jnp.abs(out - ref)))

    print("KERNEL_OK")
</pallas_src>

<mosaic_0001>
module attributes {stable_mosaic.version = 11 : i64} {
  func.func @_qnet_kernel(%arg0: i32, %arg1: memref<16x256xf32, #tpu.memory_space<vmem>>, %arg2: memref<256x512xbf16, #tpu.memory_space<vmem>>, %arg3: memref<1x512xf32, #tpu.memory_space<vmem>>, %arg4: memref<512x64xbf16, #tpu.memory_space<vmem>>, %arg5: memref<1x64xf32, #tpu.memory_space<vmem>>, %arg6: memref<16x64xf32, #tpu.memory_space<vmem>>) attributes {dimension_semantics = [#tpu.dimension_semantics<parallel>], iteration_bounds = array<i64: 2>, scalar_prefetch = 0 : i64, scratch_operands = 0 : i64, tpu.core_type = #tpu.core_type<tc>, window_params = [{transform_indices = @transform_0, window_bounds = array<i64: 16, 256>}, {pipeline_mode = #tpu.pipeline_mode<synchronous>, transform_indices = @transform_1, window_bounds = array<i64: 256, 512>}, {pipeline_mode = #tpu.pipeline_mode<synchronous>, transform_indices = @transform_2, window_bounds = array<i64: 1, 512>}, {pipeline_mode = #tpu.pipeline_mode<synchronous>, transform_indices = @transform_3, window_bounds = array<i64: 512, 64>}, {pipeline_mode = #tpu.pipeline_mode<synchronous>, transform_indices = @transform_4, window_bounds = array<i64: 1, 64>}, {transform_indices = @transform_5, window_bounds = array<i64: 16, 64>}]} {
    %c0 = arith.constant 0 : index
    %c0_0 = arith.constant 0 : index
    %0 = vector.load %arg1[%c0, %c0_0] : memref<16x256xf32, #tpu.memory_space<vmem>>, vector<16x256xf32>
    %1 = arith.truncf %0 : vector<16x256xf32> to vector<16x256xbf16>
    %c0_1 = arith.constant 0 : index
    %c0_2 = arith.constant 0 : index
    %2 = vector.load %arg2[%c0_1, %c0_2] : memref<256x512xbf16, #tpu.memory_space<vmem>>, vector<256x512xbf16>
    %cst = arith.constant dense<0.000000e+00> : vector<16x512xf32>
    %3 = tpu.matmul %1, %2, %cst {dimension_numbers = #tpu.dot_dimension_numbers<[1], [0], [0], [1], [0, 0, 1, 1], [], []>} : vector<16x256xbf16>, vector<256x512xbf16>, vector<16x512xf32> -> vector<16x512xf32>
    %c0_3 = arith.constant 0 : index
    %c0_4 = arith.constant 0 : index
    %4 = vector.load %arg3[%c0_3, %c0_4] : memref<1x512xf32, #tpu.memory_space<vmem>>, vector<1x512xf32>
    %5 = vector.broadcast %4 : vector<1x512xf32> to vector<16x512xf32>
    %6 = arith.addf %3, %5 : vector<16x512xf32>
    %cst_5 = arith.constant 0.000000e+00 : f32
    %7 = vector.broadcast %cst_5 : f32 to vector<16x512xf32>
    %8 = arith.maximumf %6, %7 : vector<16x512xf32>
    %9 = arith.truncf %8 : vector<16x512xf32> to vector<16x512xbf16>
    %c0_6 = arith.constant 0 : index
    %c0_7 = arith.constant 0 : index
    %10 = vector.load %arg4[%c0_6, %c0_7] : memref<512x64xbf16, #tpu.memory_space<vmem>>, vector<512x64xbf16>
    %cst_8 = arith.constant dense<0.000000e+00> : vector<16x64xf32>
    %11 = tpu.matmul %9, %10, %cst_8 {dimension_numbers = #tpu.dot_dimension_numbers<[1], [0], [0], [1], [0, 0, 1, 1], [], []>} : vector<16x512xbf16>, vector<512x64xbf16>, vector<16x64xf32> -> vector<16x64xf32>
    %c0_9 = arith.constant 0 : index
    %c0_10 = arith.constant 0 : index
    %12 = vector.load %arg5[%c0_9, %c0_10] : memref<1x64xf32, #tpu.memory_space<vmem>>, vector<1x64xf32>
    %13 = vector.broadcast %12 : vector<1x64xf32> to vector<16x64xf32>
    %14 = arith.addf %11, %13 : vector<16x64xf32>
    %c0_11 = arith.constant 0 : index
    %c0_12 = arith.constant 0 : index
    %15 = vector.load %arg6[%c0_11, %c0_12] : memref<16x64xf32, #tpu.memory_space<vmem>>, vector<16x64xf32>
    tpu.vector_store %arg6[%c0_11, %c0_12], %14 {strides = array<i32>} : memref<16x64xf32, #tpu.memory_space<vmem>>, vector<16x64xf32>,
    return
  }
  func.func @transform_0(%arg0: i32) -> (i32, i32) {
    %c0_i32 = arith.constant 0 : i32
    %c0_i32_0 = arith.constant 0 : i32
    return %arg0, %c0_i32 : i32, i32
  }
  func.func @transform_1(%arg0: i32) -> (i32, i32) {
    %c0_i32 = arith.constant 0 : i32
    %c0_i32_0 = arith.constant 0 : i32
    %c0_i32_1 = arith.constant 0 : i32
    return %c0_i32, %c0_i32_0 : i32, i32
  }
  func.func @transform_2(%arg0: i32) -> (i32, i32) {
    %c0_i32 = arith.constant 0 : i32
    %c0_i32_0 = arith.constant 0 : i32
    %c0_i32_1 = arith.constant 0 : i32
    return %c0_i32, %c0_i32_0 : i32, i32
  }
  func.func @transform_3(%arg0: i32) -> (i32, i32) {
    %c0_i32 = arith.constant 0 : i32
    %c0_i32_0 = arith.constant 0 : i32
    %c0_i32_1 = arith.constant 0 : i32
    return %c0_i32, %c0_i32_0 : i32, i32
  }
  func.func @transform_4(%arg0: i32) -> (i32, i32) {
    %c0_i32 = arith.constant 0 : i32
    %c0_i32_0 = arith.constant 0 : i32
    %c0_i32_1 = arith.constant 0 : i32
    return %c0_i32, %c0_i32_0 : i32, i32
  }
  func.func @transform_5(%arg0: i32) -> (i32, i32) {
    %c0_i32 = arith.constant 0 : i32
    %c0_i32_0 = arith.constant 0 : i32
    return %arg0, %c0_i32 : i32, i32
  }
}

</mosaic_0001>

<bundles_post_ra>
// kernel: tpu_custom_call.1
= control target key start
LH: loop header
LB: loop body
LE: loop exit
PB: predicated region body
PF: predicated region fallthrough
CT: control target
= control target key end

     0   :  { %10 = vsyncpa [#allocation3], 0  ;;  %s1886_s0 = inlined_call_operand.vmem [shape: f32[32,256], index: 0, kind: input, shape index: {}]   ;;  %s1887_s1 = inlined_call_operand.hbm [shape: bf16[256,512], index: 1, kind: input, shape index: {}]   ;;  %s1888_s2 = inlined_call_operand.vmem [shape: f32[1,512], index: 2, kind: input, shape index: {}]   ;;  %s1889_s3 = inlined_call_operand.vmem [shape: bf16[512,64], index: 3, kind: input, shape index: {}]   ;;  %s1890_s4 = inlined_call_operand.vmem [shape: f32[1,64], index: 4, kind: input, shape index: {}]   ;;  %s1891_s5 = inlined_call_operand.hbm [shape: f32[32,64], index: 5, kind: output, shape index: {}]  }
   0x1   :  { %11 = vsyncpa [#allocation4], 0 }
   0x2   :  { %13 = vsyncpa [#allocation4 + $0x1], 0  ;;  %s1659_s18 = smov 0   ;;  %s1661_s19 = smov 0  }
   0x3   :  { %s1663_s20 = smov 0   ;;  %s1665_s21 = smov 0  }
   0x4 LB: > { %s1680_s22 = sadd.s32 4294967295, %s1621_s21   ;;  %s1191_s23 = sadd.s32 4294967294, %s1621_s21   ;;  %s1621_s21 = sphi %s1665_s21, %s1899_s21   ;;  %s1617_s20 = sphi %s1663_s20, %s1898_s20   ;;  %s1613_s19 = sphi %s1661_s19, %s1897_s19   ;;  %s1609_s18 = sphi %s1659_s18, %s1896_s18  }
   0x5   : > { %s1684_s24 = sadd.s32 1, %s1621_s21   ;;  %s136_s25 = sadd.s32 1, %s1617_s20 }
   0x6   : > { %s133_s26 = ssub.s32 %s1621_s21, %s1684_s24  ;;  %p146_p0 = scmp.ne.s32.totalorder %s1617_s20, %s1613_s19 }
   0x7   : > { %p134_p1 = scmp.eq.s32.totalorder %s133_s26, 0  ;;  %p147_p2 = scmp.eq.s32.totalorder %s1680_s22, 1 }
   0x8   : > { %p152_p3 = scmp.ne.s32.totalorder %s1613_s19, %s1609_s18  ;;  %p153_p4 = scmp.eq.s32.totalorder %s1191_s23, 1 }
   0x9   : > { %s1695_s27 = scalar_select %p134_p1, %s1617_s20, %s136_s25  }
   0xa   : > { %p1697_p5 = por %p147_p2, %p146_p0  ;;  %p1701_p6 = por %p153_p4, %p152_p3 }
   0xb   : > { %p1192_p7 = scmp.ge.s32.totalorder %s1621_s21, 1  ;;  %p160_p8 = scmp.lt.s32.totalorder %s1621_s21, 3 }
   0xc   : > { %s1893_s29 = scalar_select %p1701_p6, 1, 0 }
   0xd   : > { %p1363_p9 = scmp.eq.s32.totalorder %s1680_s22, 0  ;;  %p1708_p10 = pnand %p1192_p7, %p160_p8 }
   0xe   : > { %s1623_s6 = smov [#allocation2]  }
   0xf   : > { %s172_s7 = sshll.u32 %s1623_s6, 4  ;;  %p1355_p11 = pneg %p1708_p10  ;;  %s173_s7 = int_to_ptr.vmem [resolvable:$true] %s172_s7 }
  0x10   : > { %s1542_s8 = scalar_lea.vmem %s173_s7, 8192  ;;  %p1550_p3 = scmp.lt.s32.totalorder %s173_s7, %s173_s7 }
  0x11   : > { %p1356_p12 = pnand %p1363_p9, %p1355_p11  ;;  %p1543_p0 = scmp.ne.s32.totalorder %s173_s7, %s1542_s8 }
  0x12   : > { %p1551_p4 = scmp.lt.s32.totalorder %s1542_s8, %s1542_s8 }
  0x13   : > { %p1533_p13 = pneg %p1356_p12 }
  0x14   : > { %p1552_p6 = por %p1551_p4, %p1550_p3 }
  0x15   : > { %p1545_p1 = pnand %p1543_p0, %p1533_p13 }
  0x17   : > { %p1546_p2 = pneg %p1545_p1 }
  0x19   : > { %p1553_p7 = pnand %p1552_p6, %p1546_p2 }
  0x1b   : > { %1556 = shalt.err (!%p1553_p7)
}
  0x1c   : > { %s1624_s9 = smov 256   ;;  %s1625_s10 = smov 16  }
  0x1d   : > { %1358 = dma.hbm_to_vmem [thread:$0]  (!%p1356_p12), %s1887_s1, 8192, %s173_s7, [#allocation3], %s1624_s9, %s1624_s9, %s1625_s10  }
  0x1e   : > { %207 = sbr.rel (%p1708_p10) target bundleno = 526 (0x20e), region = 40 }
  0x23   : > { %1600 = dma.done.wait (%p1363_p9), [#allocation3], 8192  }
  0x24   : > { %1602 = vsyncadd (%p1363_p9), [#allocation3], 4294959104  ;;  %v1403_v0 = vld [vmem:[#allocation2 + $0xe4] ss:$16 sps:$4 sm:$0xff]   ;;  %v1405_v1 = vld [vmem:[#allocation2 + $0xec] ss:$16 sps:$4 sm:$0xff]  }
  0x25   : > { %657 = vmatprep.subr.bf16.mxu0 %v1403_v0  ;;  %v1407_v2 = vld [vmem:[#allocation2 + $0xe0] ss:$16 sps:$4 sm:$0xff]   ;;  %v1408_v3 = vld [vmem:[#allocation2 + $0xe8] ss:$16 sps:$4 sm:$0xff]   ;;  %700 = vmatprep.subr.bf16.mxu1 %v1405_v1  ;;  %v1409_v4 = vld [vmem:[#allocation2 + $0xc4] ss:$16 sps:$4 sm:$0xff]  }
  0x26   : > { %658 = vmatpush1.bf16.msra.mxu0 %v1407_v2  ;;  %701 = vmatpush1.bf16.msra.mxu1 %v1408_v3  ;;  %v1411_v5 = vld [vmem:[#allocation2 + $0xcc] ss:$16 sps:$4 sm:$0xff]   ;;  %v1413_v6 = vld [vmem:[#allocation2 + $0xc0] ss:$16 sps:$4 sm:$0xff]   ;;  %v1414_v7 = vld [vmem:[#allocation2 + $0xc8] ss:$16 sps:$4 sm:$0xff]  }
  0x27   : > { %659 = vmatprep.subr.bf16.mxu0 %v1409_v4  ;;  %702 = vmatprep.subr.bf16.mxu1 %v1411_v5  ;;  %v1415_v8 = vld [vmem:[#allocation2 + $0xa4] ss:$16 sps:$4 sm:$0xff]   ;;  %v1417_v9 = vld [vmem:[#allocation2 + $0xac] ss:$16 sps:$4 sm:$0xff]   ;;  %v1419_v10 = vld [vmem:[#allocation2 + $0xa0] ss:$16 sps:$4 sm:$0xff]  }
  0x28   : > { %v1420_v11 = vld [vmem:[#allocation2 + $0xa8] ss:$16 sps:$4 sm:$0xff]   ;;  %v1421_v12 = vld [vmem:[#allocation2 + $0x84] ss:$16 sps:$4 sm:$0xff]   ;;  %v1423_v13 = vld [vmem:[#allocation2 + $0x8c] ss:$16 sps:$4 sm:$0xff]  }
  0x29   : > { %v1425_v14 = vld [vmem:[#allocation2 + $0x80] ss:$16 sps:$4 sm:$0xff]   ;;  %v1426_v15 = vld [vmem:[#allocation2 + $0x88] ss:$16 sps:$4 sm:$0xff]   ;;  %v1427_v16 = vld [vmem:[#allocation2 + $0x64] ss:$16 sps:$4 sm:$0xff]  }
  0x2a   : > { %660 = vmatpush1.bf16.msra.mxu0 %v1413_v6  ;;  %703 = vmatpush1.bf16.msra.mxu1 %v1414_v7  ;;  %v1429_v17 = vld [vmem:[#allocation2 + $0x6c] ss:$16 sps:$4 sm:$0xff]   ;;  %v1431_v18 = vld [vmem:[#allocation2 + $0x60] ss:$16 sps:$4 sm:$0xff]   ;;  %v1432_v19 = vld [vmem:[#allocation2 + $0x68] ss:$16 sps:$4 sm:$0xff]  }
  0x2b   : > { %661 = vmatprep.subr.bf16.mxu0 %v1415_v8  ;;  %704 = vmatprep.subr.bf16.mxu1 %v1417_v9  ;;  %v1433_v20 = vld [vmem:[#allocation2 + $0x44] ss:$16 sps:$4 sm:$0xff]   ;;  %v1435_v21 = vld [vmem:[#allocation2 + $0x4c] ss:$16 sps:$4 sm:$0xff]   ;;  %v1437_v22 = vld [vmem:[#allocation2 + $0x40] ss:$16 sps:$4 sm:$0xff]  }
  0x2c   : > { %v1438_v23 = vld [vmem:[#allocation2 + $0x48] ss:$16 sps:$4 sm:$0xff]   ;;  %v1439_v24 = vld [vmem:[#allocation2 + $0x24] ss:$16 sps:$4 sm:$0xff]   ;;  %v1441_v25 = vld [vmem:[#allocation2 + $0x2c] ss:$16 sps:$4 sm:$0xff]  }
  0x2d   : > { %v1443_v26 = vld [vmem:[#allocation2 + $0x20] ss:$16 sps:$4 sm:$0xff]   ;;  %v1444_v27 = vld [vmem:[#allocation2 + $0x28] ss:$16 sps:$4 sm:$0xff]   ;;  %v1445_v28 = vld [vmem:[#allocation2 + $0x4] ss:$16 sps:$4 sm:$0xff]  }
  0x2e   : > { %662 = vmatpush1.bf16.msra.mxu0 %v1419_v10  ;;  %705 = vmatpush1.bf16.msra.mxu1 %v1420_v11  ;;  %v1447_v29 = vld [vmem:[#allocation2 + $0xc] ss:$16 sps:$4 sm:$0xff]   ;;  %s1198_s13 = sshll.u32 %s1680_s22, 1  ;;  %v1449_v30 = vld [vmem:[#allocation2] ss:$16 sps:$4 sm:$0xff]   ;;  %s233_s26 = sand.u32 1, %s1613_s19  }
  0x2f   : > { %663 = vmatprep.subr.bf16.mxu0 %v1421_v12  ;;  %706 = vmatprep.subr.bf16.mxu1 %v1423_v13  ;;  %v1450_v31 = vld [vmem:[#allocation2 + $0x8] ss:$16 sps:$4 sm:$0xff]   ;;  %v1451_v32 = vld [vmem:[#allocation2 + $0x1e4] ss:$16 sps:$4 sm:$0xff]   ;;  %p237_p6 = scmp.lt.s32.totalorder %s1198_s13, 3  ;;  %s1197_s7 = sshll.u32 %s233_s26, 4 }
  0x30   : > { %v1453_v33 = vld [vmem:[#allocation2 + $0x1ec] ss:$16 sps:$4 sm:$0xff]   ;;  %v1455_v34 = vld [vmem:[#allocation2 + $0x1e0] ss:$16 sps:$4 sm:$0xff]   ;;  %v1456_v35 = vld [vmem:[#allocation2 + $0x1e8] ss:$16 sps:$4 sm:$0xff]  }
  0x31   : > { %v1457_v36 = vld [vmem:[#allocation2 + $0x1c4] ss:$16 sps:$4 sm:$0xff]   ;;  %s1901_s13 = smov (!%p237_p6, %s1198_s13), 3  ;;  %v1459_v37 = vld [vmem:[#allocation2 + $0x1cc] ss:$16 sps:$4 sm:$0xff]   ;;  %vm1100_vm0 = vcmask 523264  }
  0x32   : > { %664 = vmatpush1.bf16.msra.mxu0 %v1425_v14  ;;  %707 = vmatpush1.bf16.msra.mxu1 %v1426_v15  ;;  %v1461_v38 = vld [vmem:[#allocation2 + $0x1c0] ss:$16 sps:$4 sm:$0xff]   ;;  %v1462_v39 = vld [vmem:[#allocation2 + $0x1c8] ss:$16 sps:$4 sm:$0xff]   ;;  %v1463_v40 = vld [vmem:[#allocation2 + $0x1a4] ss:$16 sps:$4 sm:$0xff]  }
  0x33   : > { %665 = vmatprep.subr.bf16.mxu0 %v1427_v16  ;;  %708 = vmatprep.subr.bf16.mxu1 %v1429_v17  ;;  %s1303_s14 = sshll.u32 %s1901_s13, 4  ;;  %v1465_v41 = vld [vmem:[#allocation2 + $0x1ac] ss:$16 sps:$4 sm:$0xff]   ;;  %v1467_v42 = vld [vmem:[#allocation2 + $0x1a0] ss:$16 sps:$4 sm:$0xff]   ;;  %s1304_s8 = sshll.u32 %s1680_s22, 8 }
  0x34   : > { %v1468_v43 = vld [vmem:[#allocation2 + $0x1a8] ss:$16 sps:$4 sm:$0xff]   ;;  %s1729_s17 = scalar_lea.vmem %s1886_s0, %s1303_s14  ;;  %v1469_v44 = vld [vmem:[#allocation2 + $0x184] ss:$16 sps:$4 sm:$0xff]   ;;  %v1471_v45 = vld [vmem:[#allocation2 + $0x18c] ss:$16 sps:$4 sm:$0xff]   ;;  %s1842_s13 = scalar_lea.hbm %s1891_s5, %s1304_s8 }
  0x35   : > { %v246_v46 = vld [vmem:[%s1729_s17 + $0x8] sm:$0xff]  ;;  %v1473_v47 = vld [vmem:[#allocation2 + $0x180] ss:$16 sps:$4 sm:$0xff]   ;;  %v248_v49 = vld [vmem:[%s1729_s17 + $0x18] sm:$0xff]  ;;  %s235_s9 = scalar_lea.vmem [#allocation5], %s1197_s7  ;;  %s1846_s14 = scalar_lea.sflag [#allocation4], %s233_s26 }
  0x36   : > { %666 = vmatpush1.bf16.msra.mxu0 %v1431_v18  ;;  %709 = vmatpush1.bf16.msra.mxu1 %v1432_v19  ;;  %v1474_v48 = vld [vmem:[#allocation2 + $0x188] ss:$16 sps:$4 sm:$0xff]   ;;  %v1475_v50 = vld [vmem:[#allocation2 + $0x164] ss:$16 sps:$4 sm:$0xff]   ;;  %v250_v51 = vpack.c.bf16 %v248_v49, %v246_v46  ;;  %v1477_v52 = vld [vmem:[#allocation2 + $0x16c] ss:$16 sps:$4 sm:$0xff]  }
  0x37   : > { %667 = vmatprep.subr.bf16.mxu0 %v1433_v20  ;;  %710 = vmatprep.subr.bf16.mxu1 %v1435_v21  ;;  %v1479_v53 = vld [vmem:[#allocation2 + $0x160] ss:$16 sps:$4 sm:$0xff]   ;;  %v1480_v54 = vld [vmem:[#allocation2 + $0x168] ss:$16 sps:$4 sm:$0xff]   ;;  %v1481_v55 = vld [vmem:[#allocation2 + $0x144] ss:$16 sps:$4 sm:$0xff]  }
  0x38   : > { %689 = vmatprep.mubr.bf16.mxu0 %v250_v51  ;;  %732 = vmatprep.mubr.bf16.mxu1 %v250_v51  ;;  %v1483_v56 = vld [vmem:[#allocation2 + $0x14c] ss:$16 sps:$4 sm:$0xff]   ;;  %v1485_v57 = vld [vmem:[#allocation2 + $0x140] ss:$16 sps:$4 sm:$0xff]   ;;  %v1486_v58 = vld [vmem:[#allocation2 + $0x148] ss:$16 sps:$4 sm:$0xff]  }
  0x39   : > { %v1487_v59 = vld [vmem:[#allocation2 + $0x124] ss:$16 sps:$4 sm:$0xff]   ;;  %v1489_v60 = vld [vmem:[#allocation2 + $0x12c] ss:$16 sps:$4 sm:$0xff]   ;;  %v1491_v61 = vld [vmem:[#allocation2 + $0x120] ss:$16 sps:$4 sm:$0xff]  }
  0x3a   : > { %668 = vmatpush1.bf16.msra.mxu0 %v1437_v22  ;;  %711 = vmatpush1.bf16.msra.mxu1 %v1438_v23  ;;  %v1492_v62 = vld [vmem:[#allocation2 + $0x128] ss:$16 sps:$4 sm:$0xff]   ;;  %v1493_v63 = vld [vmem:[#allocation2 + $0x104] ss:$16 sps:$4 sm:$0xff]   ;;  %v1495_v0 = vld [vmem:[#allocation2 + $0x10c] ss:$16 sps:$4 sm:$0xff]  }
  0x3b   : > { %669 = vmatprep.subr.bf16.mxu0 %v1439_v24  ;;  %712 = vmatprep.subr.bf16.mxu1 %v1441_v25  ;;  %v1497_v1 = vld [vmem:[#allocation2 + $0x100] ss:$16 sps:$4 sm:$0xff]   ;;  %v1498_v2 = vld [vmem:[#allocation2 + $0x108] ss:$16 sps:$4 sm:$0xff]   ;;  %s1117_s10 = sshll.u32 %s235_s9, 4  ;;  %s1626_s15 = smov [#allocation5]   ;;  %s1844_s10 = int_to_ptr.vmem [resolvable:$true] %s1117_s10 }
  0x3c   : > { %v245_v3 = vld [vmem:[%s1729_s17] sm:$0xff]  ;;  %v247_v4 = vld [vmem:[%s1729_s17 + $0x10] sm:$0xff]  ;;  %v1499_v5 = vld [vmem:[%s1889_s3 + $0x78] sm:$0xff]   ;;  %s1557_s22 = scalar_lea.vmem %s1844_s10, 256  ;;  %s1561_s16 = sshll.u32 %s1626_s15, 4  ;;  %s1562_s16 = int_to_ptr.vmem [resolvable:$false] %s1561_s16 }
  0x3d   : > { %v1500_v6 = vld [vmem:[%s1889_s3 + $0xf8] sm:$0xff]   ;;  %v249_v9 = vpack.c.bf16 %v247_v4, %v245_v3  ;;  %v1503_v10 = vld [vmem:[%s1889_s3 + $0x70] sm:$0xff]   ;;  %v1507_v14 = vld [vmem:[%s1889_s3 + $0x68] sm:$0xff]   ;;  %p1558_p8 = scmp.ne.s32.totalorder %s1844_s10, %s1557_s22  ;;  %s1563_s17 = scalar_lea.vmem %s1562_s16, 512 }
  0x3e   : > { %670 = vmatpush1.bf16.msra.mxu0 %v1443_v26  ;;  %713 = vmatpush1.bf16.msra.mxu1 %v1444_v27  ;;  %v1501_v7 = vld [vmem:[%s1889_s3 + $0x38] sm:$0xff]   ;;  %v1504_v11 = vld [vmem:[%s1889_s3 + $0xf0] sm:$0xff]   ;;  %v1508_v15 = vld [vmem:[%s1889_s3 + $0xe8] sm:$0xff]   ;;  %p1564_p11 = scmp.lt.s32.totalorder %s1844_s10, %s1562_s16  ;;  %p1565_p12 = scmp.lt.s32.totalorder %s1563_s17, %s1557_s22 }
  0x3f   : > { %671 = vmatprep.subr.bf16.mxu0 %v1445_v28  ;;  %714 = vmatprep.subr.bf16.mxu1 %v1447_v29  ;;  %v1502_v8 = vld [vmem:[%s1889_s3 + $0xb8] sm:$0xff]   ;;  %v1505_v12 = vld [vmem:[%s1889_s3 + $0x30] sm:$0xff]   ;;  %v1509_v16 = vld [vmem:[%s1889_s3 + $0x28] sm:$0xff]   ;;  %p1559_p9 = pnand %p1558_p8, %p1697_p5 }
  0x40   : > { %v1506_v13 = vld [vmem:[%s1889_s3 + $0xb0] sm:$0xff]   ;;  %v1510_v17 = vld [vmem:[%s1889_s3 + $0xa8] sm:$0xff]   ;;  %v1511_v18 = vld [vmem:[%s1889_s3 + $0x60] sm:$0xff]   ;;  %p1566_p13 = por %p1565_p12, %p1564_p11 }
  0x41   : > { %v1512_v19 = vld [vmem:[%s1889_s3 + $0xe0] sm:$0xff]   ;;  %v1515_v22 = vld [vmem:[%s1889_s3 + $0x58] sm:$0xff]   ;;  %v1519_v26 = vld [vmem:[%s1889_s3 + $0x50] sm:$0xff]   ;;  %p1560_p10 = pneg %p1559_p9 }
  0x42   : > { %672 = vmatpush1.bf16.msra.mxu0 %v1449_v30  ;;  %715 = vmatpush1.bf16.msra.mxu1 %v1450_v31  ;;  %v1513_v20 = vld [vmem:[%s1889_s3 + $0x20] sm:$0xff]   ;;  %v1516_v23 = vld [vmem:[%s1889_s3 + $0xd8] sm:$0xff]   ;;  %v1520_v27 = vld [vmem:[%s1889_s3 + $0xd0] sm:$0xff]  }
  0x43   : > { %673 = vmatprep.subr.bf16.mxu0 %v1451_v32  ;;  %716 = vmatprep.subr.bf16.mxu1 %v1453_v33  ;;  %v1514_v21 = vld [vmem:[%s1889_s3 + $0xa0] sm:$0xff]   ;;  %v1517_v24 = vld [vmem:[%s1889_s3 + $0x18] sm:$0xff]   ;;  %v1521_v28 = vld [vmem:[%s1889_s3 + $0x10] sm:$0xff]   ;;  %p1567_p0 = pnand %p1566_p13, %p1560_p10 }
  0x44   : > { %v1518_v25 = vld [vmem:[%s1889_s3 + $0x98] sm:$0xff]   ;;  %v1522_v29 = vld [vmem:[%s1889_s3 + $0x90] sm:$0xff]   ;;  %v1523_v30 = vld [vmem:[%s1889_s3 + $0x48] sm:$0xff]  }
  0x45   : > { %v1524_v31 = vld [vmem:[%s1889_s3 + $0xc8] sm:$0xff]  }
  0x46   : > { %674 = vmatpush2.bf16.msra.mxu0 %v1455_v34  ;;  %717 = vmatpush2.bf16.msra.mxu1 %v1456_v35  ;;  %v1525_v32 = vld [vmem:[%s1889_s3 + $0x8] sm:$0xff]   ;;  %v1527_v34 = vld [vmem:[%s1889_s3 + $0x40] sm:$0xff]  }
  0x47   : > { %675 = vmatprep.subr.bf16.mxu0 %v1457_v36  ;;  %718 = vmatprep.subr.bf16.mxu1 %v1459_v37  ;;  %v1526_v33 = vld [vmem:[%s1889_s3 + $0x88] sm:$0xff]   ;;  %v1528_v35 = vld [vmem:[%s1889_s3 + $0xc0] sm:$0xff]  }
  0x48   : > { %v1529_v36 = vld [vmem:[%s1889_s3] sm:$0xff]  }
  0x49   : > { %v1530_v37 = vld [vmem:[%s1889_s3 + $0x80] sm:$0xff]  }
  0x4a   : > { %676 = vmatpush2.bf16.msra.mxu0 %v1461_v38  ;;  %719 = vmatpush2.bf16.msra.mxu1 %v1462_v39  ;;  %v317_v38 = vlaneseq }
  0x4b   : > { %677 = vmatprep.subr.bf16.mxu0 %v1463_v40  ;;  %720 = vmatprep.subr.bf16.mxu1 %v1465_v41 }
  0x4c   : > { %v318_v39 = vshrl.u32 %v317_v38, 7 }
  0x4e   : > { %678 = vmatpush2.bf16.msra.mxu0 %v1467_v42  ;;  %721 = vmatpush2.bf16.msra.mxu1 %v1468_v43  ;;  %v323_v40 = vsub.s32 1, %v318_v39  ;;  %v331_v41 = vsub.s32 3, %v318_v39  ;;  %v319_v42 = vsub.s32 0, %v318_v39  ;;  %v327_v43 = vsub.s32 2, %v318_v39 }
  0x4f   : > { %679 = vmatprep.subr.bf16.mxu0 %v1469_v44  ;;  %722 = vmatprep.subr.bf16.mxu1 %v1471_v45  ;;  %v315_v44 = vld [vmem:[%s1888_s2] sm:$0xf] }
  0x50   : > { %v320_v49 = vrot.slane %v315_v44, %v319_v42 }
  0x52   : > { %680 = vmatpush2.bf16.msra.mxu0 %v1473_v47  ;;  %723 = vmatpush2.bf16.msra.mxu1 %v1474_v48  ;;  %v324_v47 = vrot.slane %v315_v44, %v323_v40  ;;  %v332_v48 = vrot.slane %v315_v44, %v331_v41 }
  0x53   : > { %681 = vmatprep.subr.bf16.mxu0 %v1475_v50  ;;  %724 = vmatprep.subr.bf16.mxu1 %v1477_v52  ;;  %v328_v50 = vrot.slane %v315_v44, %v327_v43 }
  0x56   : > { %682 = vmatpush2.bf16.msra.mxu0 %v1479_v53  ;;  %725 = vmatpush2.bf16.msra.mxu1 %v1480_v54 }
  0x57   : > { %683 = vmatprep.subr.bf16.mxu0 %v1481_v55  ;;  %726 = vmatprep.subr.bf16.mxu1 %v1483_v56 }
  0x5a   : > { %684 = vmatpush2.bf16.msra.mxu0 %v1485_v57  ;;  %727 = vmatpush2.bf16.msra.mxu1 %v1486_v58 }
  0x5b   : > { %685 = vmatprep.subr.bf16.mxu0 %v1487_v59  ;;  %728 = vmatprep.subr.bf16.mxu1 %v1489_v60 }
  0x5e   : > { %686 = vmatpush2.bf16.msra.mxu0 %v1491_v61  ;;  %729 = vmatpush2.bf16.msra.mxu1 %v1492_v62 }
  0x5f   : > { %687 = vmatprep.subr.bf16.mxu0 %v1493_v63  ;;  %730 = vmatprep.subr.bf16.mxu1 %v1495_v0 }
  0x62   : > { %688 = vmatpush2.bf16.msra.mxu0 %v1497_v1  ;;  %731 = vmatpush2.bf16.msra.mxu1 %v1498_v2 }
  0x63   : > { %1305 = vmatprep.subr.bf16.mxu0 %v1499_v5  ;;  %1327 = vmatprep.subr.bf16.mxu1 %v1500_v6 }
  0x65   : > { %690 = vmatmul.mubr.bf16.vlgmr.msra.gmra.mxu0 %v249_v9  ;;  %733 = vmatmul.mubr.bf16.vlgmr.msra.gmra.mxu1 %v249_v9 }
  0x66   : > { %1306 = vmatpush3.bf16.msra.mxu0 %v1501_v7  ;;  %1328 = vmatpush3.bf16.msra.mxu1 %v1502_v8 }
  0x67   : > { %1307 = vmatprep.subr.bf16.mxu0 %v1503_v10  ;;  %1329 = vmatprep.subr.bf16.mxu1 %v1504_v11 }
  0x6a   : > { %1308 = vmatpush3.bf16.msra.mxu0 %v1505_v12  ;;  %1330 = vmatpush3.bf16.msra.mxu1 %v1506_v13 }
  0x6b   : > { %1309 = vmatprep.subr.bf16.mxu0 %v1507_v14  ;;  %1331 = vmatprep.subr.bf16.mxu1 %v1508_v15  ;;  %v1265_v15 = vld [vmem:[%s1890_s4] ss:$0 sm:$0xff] }
  0x6e   : > { %1310 = vmatpush3.bf16.msra.mxu0 %v1509_v16  ;;  %1332 = vmatpush3.bf16.msra.mxu1 %v1510_v17 }
  0x6f   : > { %1311 = vmatprep.subr.bf16.mxu0 %v1511_v18  ;;  %1333 = vmatprep.subr.bf16.mxu1 %v1512_v19 }
  0x72   : > { %1312 = vmatpush3.bf16.msra.mxu0 %v1513_v20  ;;  %1334 = vmatpush3.bf16.msra.mxu1 %v1514_v21 }
  0x73   : > { %1313 = vmatprep.subr.bf16.mxu0 %v1515_v22  ;;  %1335 = vmatprep.subr.bf16.mxu1 %v1516_v23 }
  0x76   : > { %1314 = vmatpush3.bf16.msra.mxu0 %v1517_v24  ;;  %1336 = vmatpush3.bf16.msra.mxu1 %v1518_v25 }
  0x77   : > { %1315 = vmatprep.subr.bf16.mxu0 %v1519_v26  ;;  %1337 = vmatprep.subr.bf16.mxu1 %v1520_v27 }
  0x7a   : > { %1316 = vmatpush3.bf16.msra.mxu0 %v1521_v28  ;;  %1338 = vmatpush3.bf16.msra.mxu1 %v1522_v29 }
  0x7b   : > { %1317 = vmatprep.subr.bf16.mxu0 %v1523_v30  ;;  %1339 = vmatprep.subr.bf16.mxu1 %v1524_v31 }
  0x7e   : > { %1318 = vmatpush3.bf16.msra.mxu0 %v1525_v32  ;;  %1340 = vmatpush3.bf16.msra.mxu1 %v1526_v33 }
  0x7f   : > { %1319 = vmatprep.subr.bf16.mxu0 %v1527_v34  ;;  %1341 = vmatprep.subr.bf16.mxu1 %v1528_v35 }
  0x82   : > { %1320 = vmatpush3.bf16.msra.mxu0 %v1529_v36  ;;  %1342 = vmatpush3.bf16.msra.mxu1 %v1530_v37 }
 0x125   : > { %v691_v45 = vpop.f32.mrf.mxu0  ;;  %v734_v46 = vpop.f32.mrf.mxu1 }
 0x126   : > { %v692_v59 = vadd.f32 %v691_v45, %v320_v49  ;;  %v735_v60 = vadd.f32 %v734_v46, %v328_v50 }
 0x127   : > { %v693_v51 = vpop.f32.mrf.mxu0  ;;  %v736_v52 = vpop.f32.mrf.mxu1 }
 0x128   : > { %v694_v55 = vadd.f32 %v693_v51, %v324_v47  ;;  %v737_v56 = vadd.f32 %v736_v52, %v332_v48  ;;  %v743_v7 = vmax.f32 %v692_v59, 0.0  ;;  %v745_v8 = vmax.f32 %v735_v60, 0.0 }
 0x129   : > { %v695_v53 = vpop.f32.mrf.mxu0  ;;  %v738_v54 = vpop.f32.mrf.mxu1 }
 0x12a   : > { %v696_v57 = vadd.f32 %v695_v53, %v320_v49  ;;  %v739_v58 = vadd.f32 %v738_v54, %v328_v50  ;;  %v744_v3 = vmax.f32 %v694_v55, 0.0  ;;  %v746_v4 = vmax.f32 %v737_v56, 0.0 }
 0x12b   : > { %v697_v61 = vpop.f32.mrf.mxu0  ;;  %v740_v62 = vpop.f32.mrf.mxu1 }
 0x12c   : > { %v698_v63 = vadd.f32 %v697_v61, %v324_v47  ;;  %v741_v0 = vadd.f32 %v740_v62, %v332_v48  ;;  %v747_v1 = vmax.f32 %v696_v57, 0.0  ;;  %v749_v2 = vmax.f32 %v739_v58, 0.0 }
 0x12e   : > { %v748_v5 = vmax.f32 %v698_v63, 0.0  ;;  %v750_v6 = vmax.f32 %v741_v0, 0.0  ;;  %v751_v11 = vpack.c.bf16 %v747_v1, %v743_v7  ;;  %v753_v12 = vpack.c.bf16 %v749_v2, %v745_v8 }
 0x130   : > { %v752_v9 = vpack.c.bf16 %v748_v5, %v744_v3  ;;  %v754_v10 = vpack.c.bf16 %v750_v6, %v746_v4 }
 0x132   : > { %1050 = vmatprep.mubr.bf16.mxu0 %v752_v9  ;;  %1091 = vmatprep.mubr.bf16.mxu1 %v754_v10 }
 0x133   : > { %1051 = vmatmul.mubr.bf16.vlgmr.msra.gmra.mxu0 %v751_v11  ;;  %1092 = vmatmul.mubr.bf16.vlgmr.msra.gmra.mxu1 %v753_v12 }
 0x1f3   : > { %v1321_v13 = vpop.f32.mrf.mxu0  ;;  %v1343_v14 = vpop.f32.mrf.mxu1 }
 0x1f5   : > { %v1322_v16 = vpop.f32.mrf.mxu0  ;;  %v1344_v17 = vpop.f32.mrf.mxu1 }
 0x1f6   : > { %v1323_v18 = vadd.f32 %v1322_v16, %v1321_v13  ;;  %v1345_v22 = vadd.f32 %v1344_v17, %v1343_v14 }
 0x1f7   : > { %v1324_v19 = vpop.f32.mrf.mxu0  ;;  %v1346_v20 = vpop.f32.mrf.mxu1 }
 0x1f8   : > { %v1053_v21 = vadd.f32 %v1323_v18, %v1265_v15 }
 0x1f9   : > { %v1325_v23 = vpop.f32.mrf.mxu0  ;;  %v1347_v24 = vpop.f32.mrf.mxu1 }
 0x1fa   : > { %v1094_v25 = vadd.f32 %v1345_v22, %v1053_v21  ;;  %v1326_v26 = vadd.f32 %v1325_v23, %v1324_v19  ;;  %v1348_v28 = vadd.f32 %v1347_v24, %v1346_v20 }
 0x1fc   : > { %1101 = vst.msk [vmem:[%s235_s9] sm:$0xff] %vm1100_vm0, %v1094_v25  ;;  %v1056_v27 = vadd.f32 %v1326_v26, %v1265_v15 }
 0x1fe   : > { %v1097_v29 = vadd.f32 %v1348_v28, %v1056_v27 }
 0x200   : > { %1102 = vst.msk [vmem:[%s235_s9 + $0x8] sm:$0xff] %vm1100_vm0, %v1097_v29 }
 0x201   : > { %1570 = shalt.err (!%p1567_p0)
}
 0x202   : > { %s1571_s23 = scalar_lea.hbm %s1842_s13, 256  ;;  %s1575_s30 = scalar_lea.hbm %s1891_s5, 512 }
 0x203   : > { %p1572_p1 = scmp.ne.s32.totalorder %s1842_s13, %s1571_s23  ;;  %p1576_p4 = scmp.lt.s32.totalorder %s1842_s13, %s1891_s5 }
 0x204   : > { %p1577_p7 = scmp.lt.s32.totalorder %s1575_s30, %s1571_s23 }
 0x205   : > { %p1573_p2 = pnand %p1572_p1, %p1697_p5 }
 0x206   : > { %p1578_p6 = por %p1577_p7, %p1576_p4 }
 0x207   : > { %p1574_p3 = pneg %p1573_p2 }
 0x209   : > { %p1579_p8 = pnand %p1578_p6, %p1574_p3 }
 0x20b   : > { %1582 = shalt.err (!%p1579_p8)
}
 0x20c   : > { %s1627_s8 = smov 128   ;;  %s1628_s9 = smov 8  }
 0x20d   : > { %1353 = dma.vmem_to_hbm [thread:$0]  (%p1697_p5), %s1844_s10, 256, %s1842_s13, %s1846_s14, %s1627_s8, %s1627_s8, %s1628_s9  }
 0x20e PF: > { %p1365_p9 = scmp.ge.s32.totalorder %s1621_s21, 2  ;;  %s1132_s11 = sand.u32 1, %s1609_s18  }
 0x20f   : > { %p1895_p10 = scmp.ne.s32.totalorder %s1893_s29, 0  ;;  %s1133_s12 = scalar_lea.sflag [#allocation4], %s1132_s11 }
 0x211   : > { %p1360_p11 = pnand %p1365_p9, %p1895_p10 }
 0x213   : > { %p1361_p12 = pneg %p1360_p11 }
 0x215   : > { %1604 = dma.done.wait (%p1361_p12), %s1133_s12, 256  }
 0x216   : > { %1606 = vsyncadd (%p1361_p12), %s1133_s12, 4294967040  ;;  %p16_p13 = scmp.ge.s32.totalorder %s1684_s24, 4   ;;  %s1896_s18 = smov %s1613_s19 }
 0x217   : > { %s1897_s19 = smov %s1617_s20  ;;  %s1898_s20 = smov %s1695_s27 }
 0x218   : > { %s1899_s21 = smov %s1684_s24  ;;  %18 = sbr.rel (!%p16_p13) target bundleno = 4 (0x4), region = 80 }
 0x21d   :  { %1138 = vsyncpa [#allocation3], 1 }
 0x21e   :  { %1140 = vsyncpa [#allocation3 + $0x1], 1 }
 0x21f   :  { %1141 = vsyncpa [#allocation4], 1 }
 0x220   :  { %1143 = vsyncpa [#allocation4 + $0x1], 1 }

</bundles_post_ra>
